<compile_context>
chip_gen: v6e
topology: v6e:2x2x1
jax: 0.10.0
libtpu: 0.0.40
codegen_flags: <defaults>
</compile_context>

<pallas_src>
import jax
import jax.numpy as jnp
from jax.experimental import pallas as pl
from jax.experimental.pallas import tpu as pltpu


# ----------------------------- helpers ------------------------------------


def _round_up(x, m):
    return (x + m - 1) // m * m


def _batch_tile(b):
    # 8-row quantum (sublane), capped at 256 rows per grid step.
    return min(_round_up(max(b, 1), 8), 256)


def _elu(x):
    # ELU(alpha=1) in f32. minimum() keeps exp() finite on the branch that
    # where() discards (no cost: VPU slot).
    return jnp.where(x > 0, x, jnp.exp(jnp.minimum(x, 0.0)) - 1.0)


def _two_layer_elu(x, w1, b1, w2, b2):
    # x: (TB, K) bf16, w1: (K, R) bf16, b1: (1, R) f32,
    # w2: (R, T) bf16, b2: (1, T) f32  ->  (TB, T) f32
    h = jnp.dot(x, w1, preferred_element_type=jnp.float32) + b1
    h = _elu(h)
    pre = jnp.dot(h.astype(w2.dtype), w2, preferred_element_type=jnp.float32) + b2
    return _elu(pre)


# ----------------------------- kernels ------------------------------------


def _rhl_forward_kernel(x_ref, w1_ref, b1_ref, w2_ref, b2_ref, o_ref):
    y = _two_layer_elu(x_ref[...], w1_ref[...], b1_ref[...],
                       w2_ref[...], b2_ref[...])
    o_ref[...] = y.astype(o_ref.dtype)


def _rhl_target_kernel(xt_ref, x_ref, ht_ref, w1_ref, b1_ref, w2_ref, b2_ref,
                       o_ref):
    w1, b1, w2, b2 = w1_ref[...], b1_ref[...], w2_ref[...], b2_ref[...]
    g_t = _two_layer_elu(xt_ref[...], w1, b1, w2, b2)  # forward(output_target)
    g_x = _two_layer_elu(x_ref[...], w1, b1, w2, b2)   # forward(output) (reconstruction)
    o_ref[...] = (g_t + (ht_ref[...] - g_x)).astype(o_ref.dtype)


# ----------------------------- wrappers -----------------------------------


def prepare_feedback_rhl_params(w1, b1, w2, b2, compute_dtype=jnp.bfloat16):
    """One-time weight prep (outside the hot path): transpose to [K, N],
    zero-pad hidden/target dims to multiples of 128 and cast MXU operands
    to bf16. Padding is exact: padded b1 entries are 0 and ELU(0)=0, and the
    padded rows of W2 are 0, so padded hidden/target units contribute nothing.
    """
    r, k = w1.shape           # w1: [random_size, output_size]
    t = w2.shape[0]           # w2: [target_size, random_size]
    r_pad = _round_up(r, 128)
    t_pad = _round_up(t, 128)
    w1_kr = jnp.pad(w1, ((0, r_pad - r), (0, 0))).T.astype(compute_dtype)        # [K, R_pad]
    b1_p = jnp.pad(b1, (0, r_pad - r)).reshape(1, r_pad).astype(jnp.float32)     # [1, R_pad]
    w2_rt = jnp.pad(w2, ((0, t_pad - t), (0, r_pad - r))).T.astype(compute_dtype)  # [R_pad, T_pad]
    b2_p = jnp.pad(b2, (0, t_pad - t)).reshape(1, t_pad).astype(jnp.float32)     # [1, T_pad]
    return {"w1": w1_kr, "b1": b1_p, "w2": w2_rt, "b2": b2_p,
            "output_size": k, "target_size": t}


def feedback_rhl_forward(x, params):
    """Pallas equivalent of FeedbackLayerRHL.forward. x: [B, output_size] f32."""
    w1, b1, w2, b2 = params["w1"], params["b1"], params["w2"], params["b2"]
    t = params["target_size"]
    b, k = x.shape
    r_pad, t_pad = w1.shape[1], w2.shape[1]

    tb = _batch_tile(b)
    b_pad = _round_up(b, tb)
    xp = x.astype(w1.dtype)
    if b_pad != b:
        xp = jnp.pad(xp, ((0, b_pad - b), (0, 0)))

    cost = pl.CostEstimate(
        flops=2 * b_pad * (k * r_pad + r_pad * t_pad),
        transcendentals=b_pad * (r_pad + t_pad),
        bytes_accessed=(xp.size * xp.dtype.itemsize
                        + w1.size * w1.dtype.itemsize
                        + w2.size * w2.dtype.itemsize
                        + b1.size * 4 + b2.size * 4
                        + b_pad * t_pad * 4),
    )

    out = pl.pallas_call(
        _rhl_forward_kernel,
        out_shape=jax.ShapeDtypeStruct((b_pad, t_pad), jnp.float32),
        grid_spec=pltpu.PrefetchScalarGridSpec(
            num_scalar_prefetch=0,
            grid=(b_pad // tb,),
            in_specs=[
                pl.BlockSpec((tb, k), lambda i: (i, 0)),        # x tile
                pl.BlockSpec((k, r_pad), lambda i: (0, 0)),     # W1 (VMEM-resident)
                pl.BlockSpec((1, r_pad), lambda i: (0, 0)),     # b1
                pl.BlockSpec((r_pad, t_pad), lambda i: (0, 0)),  # W2 (VMEM-resident)
                pl.BlockSpec((1, t_pad), lambda i: (0, 0)),     # b2
            ],
            out_specs=pl.BlockSpec((tb, t_pad), lambda i: (i, 0)),
        ),
        compiler_params=pltpu.CompilerParams(
            dimension_semantics=("parallel",)),
        cost_estimate=cost,
    )(xp, w1, b1, w2, b2)
    return out[:b, :t]


def feedback_rhl_compute_target(output, output_target, hidden_true, params):
    """DDTP target: g(output_target) + hidden_true - g(output), ONE fused kernel."""
    w1, b1, w2, b2 = params["w1"], params["b1"], params["w2"], params["b2"]
    t = params["target_size"]
    b, k = output.shape
    r_pad, t_pad = w1.shape[1], w2.shape[1]

    tb = _batch_tile(b)
    b_pad = _round_up(b, tb)

    def _pad_rows(a):
        if b_pad != b:
            a = jnp.pad(a, ((0, b_pad - b), (0, 0)))
        return a

    xp = _pad_rows(output.astype(w1.dtype))
    xtp = _pad_rows(output_target.astype(w1.dtype))
    htp = hidden_true.astype(jnp.float32)
    if (b_pad != b) or (t_pad != t):
        htp = jnp.pad(htp, ((0, b_pad - b), (0, t_pad - t)))

    cost = pl.CostEstimate(
        flops=4 * b_pad * (k * r_pad + r_pad * t_pad),
        transcendentals=2 * b_pad * (r_pad + t_pad),
        bytes_accessed=(2 * xp.size * xp.dtype.itemsize
                        + htp.size * 4
                        + w1.size * w1.dtype.itemsize
                        + w2.size * w2.dtype.itemsize
                        + b1.size * 4 + b2.size * 4
                        + b_pad * t_pad * 4),
    )

    out = pl.pallas_call(
        _rhl_target_kernel,
        out_shape=jax.ShapeDtypeStruct((b_pad, t_pad), jnp.float32),
        grid_spec=pltpu.PrefetchScalarGridSpec(
            num_scalar_prefetch=0,
            grid=(b_pad // tb,),
            in_specs=[
                pl.BlockSpec((tb, k), lambda i: (i, 0)),        # output_target tile
                pl.BlockSpec((tb, k), lambda i: (i, 0)),        # output tile
                pl.BlockSpec((tb, t_pad), lambda i: (i, 0)),    # hidden_true tile
                pl.BlockSpec((k, r_pad), lambda i: (0, 0)),     # W1
                pl.BlockSpec((1, r_pad), lambda i: (0, 0)),     # b1
                pl.BlockSpec((r_pad, t_pad), lambda i: (0, 0)),  # W2
                pl.BlockSpec((1, t_pad), lambda i: (0, 0)),     # b2
            ],
            out_specs=pl.BlockSpec((tb, t_pad), lambda i: (i, 0)),
        ),
        compiler_params=pltpu.CompilerParams(
            dimension_semantics=("parallel",)),
        cost_estimate=cost,
    )(xtp, xp, htp, w1, b1, w2, b2)
    return out[:b, :t]


# ------------------------------- demo --------------------------------------


def _xavier_normal(key, fan_out, fan_in):
    std = (2.0 / (fan_in + fan_out)) ** 0.5
    return std * jax.random.normal(key, (fan_out, fan_in), dtype=jnp.float32)


if __name__ == "__main__":
    key = jax.random.PRNGKey(0)
    k1, k2, kx, kxt, kh = jax.random.split(key, 5)

    batch = 8
    output_size = 32     # size of the network's output layer
    random_size = 256    # random hidden layer (kept small for the demo)
    target_size = 64     # hidden layer receiving feedback

    # PyTorch nn.Linear layout weights, Xavier-normal init, zero bias.
    w1 = _xavier_normal(k1, random_size, output_size)   # [R, K]
    b1 = jnp.zeros((random_size,), jnp.float32)
    w2 = _xavier_normal(k2, target_size, random_size)   # [T, R]
    b2 = jnp.zeros((target_size,), jnp.float32)

    params = prepare_feedback_rhl_params(w1, b1, w2, b2)

    x = jax.random.normal(kx, (batch, output_size), dtype=jnp.float32)
    x_tgt = jax.random.normal(kxt, (batch, output_size), dtype=jnp.float32)
    h_true = jax.random.normal(kh, (batch, target_size), dtype=jnp.float32)

    # forward pass through the Pallas kernel
    y = feedback_rhl_forward(x, params)
    jax.block_until_ready(y)

    # plain-JAX f32 reference (kernel uses bf16 MXU operands -> loose atol)
    def _elu_ref(v):
        return jnp.where(v > 0, v, jnp.exp(jnp.minimum(v, 0.0)) - 1.0)

    def _fwd_ref(v):
        h = _elu_ref(v @ w1.T + b1)
        return _elu_ref(h @ w2.T + b2)

    y_ref = _fwd_ref(x)
    assert y.shape == (batch, target_size)
    assert jnp.allclose(y, y_ref, atol=3e-2, rtol=0.0), float(
        jnp.max(jnp.abs(y - y_ref)))

    # fused compute_target kernel
    tgt = feedback_rhl_compute_target(x, x_tgt, h_true, params)
    jax.block_until_ready(tgt)
    tgt_ref = _fwd_ref(x_tgt) + (h_true - _fwd_ref(x))
    assert tgt.shape == (batch, target_size)
    assert jnp.allclose(tgt, tgt_ref, atol=5e-2, rtol=0.0), float(
        jnp.max(jnp.abs(tgt - tgt_ref)))

    print("KERNEL_OK")
</pallas_src>

<mosaic_0001>
module attributes {stable_mosaic.version = 11 : i64} {
  func.func @_rhl_forward_kernel(%arg0: i32, %arg1: memref<8x32xbf16, #tpu.memory_space<vmem>>, %arg2: memref<32x256xbf16, #tpu.memory_space<vmem>>, %arg3: memref<1x256xf32, #tpu.memory_space<vmem>>, %arg4: memref<256x128xbf16, #tpu.memory_space<vmem>>, %arg5: memref<1x128xf32, #tpu.memory_space<vmem>>, %arg6: memref<8x128xf32, #tpu.memory_space<vmem>>) attributes {dimension_semantics = [#tpu.dimension_semantics<parallel>], iteration_bounds = array<i64: 1>, scalar_prefetch = 0 : i64, scratch_operands = 0 : i64, tpu.core_type = #tpu.core_type<tc>, window_params = [{transform_indices = @transform_0, window_bounds = array<i64: 8, 32>}, {pipeline_mode = #tpu.pipeline_mode<synchronous>, transform_indices = @transform_1, window_bounds = array<i64: 32, 256>}, {pipeline_mode = #tpu.pipeline_mode<synchronous>, transform_indices = @transform_2, window_bounds = array<i64: 1, 256>}, {pipeline_mode = #tpu.pipeline_mode<synchronous>, transform_indices = @transform_3, window_bounds = array<i64: 256, 128>}, {pipeline_mode = #tpu.pipeline_mode<synchronous>, transform_indices = @transform_4, window_bounds = array<i64: 1, 128>}, {transform_indices = @transform_5, window_bounds = array<i64: 8, 128>}]} {
    %c0 = arith.constant 0 : index
    %c0_0 = arith.constant 0 : index
    %0 = vector.load %arg1[%c0, %c0_0] : memref<8x32xbf16, #tpu.memory_space<vmem>>, vector<8x32xbf16>
    %c0_1 = arith.constant 0 : index
    %c0_2 = arith.constant 0 : index
    %1 = vector.load %arg2[%c0_1, %c0_2] : memref<32x256xbf16, #tpu.memory_space<vmem>>, vector<32x256xbf16>
    %c0_3 = arith.constant 0 : index
    %c0_4 = arith.constant 0 : index
    %2 = vector.load %arg3[%c0_3, %c0_4] : memref<1x256xf32, #tpu.memory_space<vmem>>, vector<1x256xf32>
    %c0_5 = arith.constant 0 : index
    %c0_6 = arith.constant 0 : index
    %3 = vector.load %arg4[%c0_5, %c0_6] : memref<256x128xbf16, #tpu.memory_space<vmem>>, vector<256x128xbf16>
    %c0_7 = arith.constant 0 : index
    %c0_8 = arith.constant 0 : index
    %4 = vector.load %arg5[%c0_7, %c0_8] : memref<1x128xf32, #tpu.memory_space<vmem>>, vector<1x128xf32>
    %cst = arith.constant dense<0.000000e+00> : vector<8x256xf32>
    %5 = tpu.matmul %0, %1, %cst {dimension_numbers = #tpu.dot_dimension_numbers<[1], [0], [0], [1], [0, 0, 1, 1], [], []>} : vector<8x32xbf16>, vector<32x256xbf16>, vector<8x256xf32> -> vector<8x256xf32>
    %6 = vector.broadcast %2 : vector<1x256xf32> to vector<8x256xf32>
    %7 = arith.addf %5, %6 : vector<8x256xf32>
    %cst_9 = arith.constant 0.000000e+00 : f32
    %8 = vector.broadcast %cst_9 : f32 to vector<8x256xf32>
    %9 = arith.cmpf ogt, %7, %8 : vector<8x256xf32>
    %cst_10 = arith.constant 0.000000e+00 : f32
    %10 = vector.broadcast %cst_10 : f32 to vector<8x256xf32>
    %11 = arith.minimumf %7, %10 : vector<8x256xf32>
    %12 = math.exp %11 : vector<8x256xf32>
    %cst_11 = arith.constant 1.000000e+00 : f32
    %13 = vector.broadcast %cst_11 : f32 to vector<8x256xf32>
    %14 = arith.subf %12, %13 : vector<8x256xf32>
    %15 = arith.select %9, %7, %14 : vector<8x256xi1>, vector<8x256xf32>
    %16 = arith.truncf %15 : vector<8x256xf32> to vector<8x256xbf16>
    %cst_12 = arith.constant dense<0.000000e+00> : vector<8x128xf32>
    %17 = tpu.matmul %16, %3, %cst_12 {dimension_numbers = #tpu.dot_dimension_numbers<[1], [0], [0], [1], [0, 0, 1, 1], [], []>} : vector<8x256xbf16>, vector<256x128xbf16>, vector<8x128xf32> -> vector<8x128xf32>
    %18 = vector.broadcast %4 : vector<1x128xf32> to vector<8x128xf32>
    %19 = arith.addf %17, %18 : vector<8x128xf32>
    %cst_13 = arith.constant 0.000000e+00 : f32
    %20 = vector.broadcast %cst_13 : f32 to vector<8x128xf32>
    %21 = arith.cmpf ogt, %19, %20 : vector<8x128xf32>
    %cst_14 = arith.constant 0.000000e+00 : f32
    %22 = vector.broadcast %cst_14 : f32 to vector<8x128xf32>
    %23 = arith.minimumf %19, %22 : vector<8x128xf32>
    %24 = math.exp %23 : vector<8x128xf32>
    %cst_15 = arith.constant 1.000000e+00 : f32
    %25 = vector.broadcast %cst_15 : f32 to vector<8x128xf32>
    %26 = arith.subf %24, %25 : vector<8x128xf32>
    %27 = arith.select %21, %19, %26 : vector<8x128xi1>, vector<8x128xf32>
    %c0_16 = arith.constant 0 : index
    %c0_17 = arith.constant 0 : index
    %28 = vector.load %arg6[%c0_16, %c0_17] : memref<8x128xf32, #tpu.memory_space<vmem>>, vector<8x128xf32>
    tpu.vector_store %arg6[%c0_16, %c0_17], %27 {strides = array<i32>} : memref<8x128xf32, #tpu.memory_space<vmem>>, vector<8x128xf32>,
    return
  }
  func.func @transform_0(%arg0: i32) -> (i32, i32) {
    %c0_i32 = arith.constant 0 : i32
    %c0_i32_0 = arith.constant 0 : i32
    return %arg0, %c0_i32 : i32, i32
  }
  func.func @transform_1(%arg0: i32) -> (i32, i32) {
    %c0_i32 = arith.constant 0 : i32
    %c0_i32_0 = arith.constant 0 : i32
    %c0_i32_1 = arith.constant 0 : i32
    return %c0_i32, %c0_i32_0 : i32, i32
  }
  func.func @transform_2(%arg0: i32) -> (i32, i32) {
    %c0_i32 = arith.constant 0 : i32
    %c0_i32_0 = arith.constant 0 : i32
    %c0_i32_1 = arith.constant 0 : i32
    return %c0_i32, %c0_i32_0 : i32, i32
  }
  func.func @transform_3(%arg0: i32) -> (i32, i32) {
    %c0_i32 = arith.constant 0 : i32
    %c0_i32_0 = arith.constant 0 : i32
    %c0_i32_1 = arith.constant 0 : i32
    return %c0_i32, %c0_i32_0 : i32, i32
  }
  func.func @transform_4(%arg0: i32) -> (i32, i32) {
    %c0_i32 = arith.constant 0 : i32
    %c0_i32_0 = arith.constant 0 : i32
    %c0_i32_1 = arith.constant 0 : i32
    return %c0_i32, %c0_i32_0 : i32, i32
  }
  func.func @transform_5(%arg0: i32) -> (i32, i32) {
    %c0_i32 = arith.constant 0 : i32
    %c0_i32_0 = arith.constant 0 : i32
    return %arg0, %c0_i32 : i32, i32
  }
}

</mosaic_0001>

<bundles_post_ra>
// kernel: tpu_custom_call.1
= control target key start
LH: loop header
LB: loop body
LE: loop exit
PB: predicated region body
PF: predicated region fallthrough
CT: control target
= control target key end

     0   :  { %10 = vsyncpa [#allocation3], 0  ;;  %s582_s0 = inlined_call_operand.hbm [shape: bf16[8,32], index: 0, kind: input, shape index: {}]   ;;  %s583_s1 = inlined_call_operand.hbm [shape: bf16[32,256], index: 1, kind: input, shape index: {}]   ;;  %s584_s2 = inlined_call_operand.vmem [shape: f32[1,256], index: 2, kind: input, shape index: {}]   ;;  %s585_s3 = inlined_call_operand.hbm [shape: bf16[256,128], index: 3, kind: input, shape index: {}]   ;;  %s586_s4 = inlined_call_operand.vmem [shape: f32[1,128], index: 4, kind: input, shape index: {}]   ;;  %s587_s5 = inlined_call_operand.hbm [shape: f32[8,128], index: 5, kind: output, shape index: {}]  }
   0x1   :  { %11 = vsyncpa [#allocation6], 0 }
   0x2   :  { %12 = vsyncpa [#allocation4], 0  ;;  %s525_s18 = smov [#allocation5]  }
   0x3   :  { %s28_s19 = sshll.u32 %s525_s18, 4  ;;  %s29_s19 = int_to_ptr.vmem [resolvable:$true] %s28_s19 }
   0x4   :  { %s447_s20 = scalar_lea.vmem %s29_s19, 512  ;;  %p452_p1 = scmp.lt.s32.totalorder %s29_s19, %s29_s19 }
   0x5   :  { %p448_p0 = scmp.ne.s32.totalorder %s29_s19, %s447_s20  ;;  %p453_p2 = scmp.lt.s32.totalorder %s447_s20, %s447_s20 }
   0x7   :  { %p454_p3 = por %p453_p2, %p452_p1 }
   0x9   :  { %p455_p4 = pnand %p454_p3, %p448_p0 }
   0xb   :  { %458 = shalt.err (!%p455_p4)
}
   0xc   :  { %s526_s21 = smov 128   ;;  %s527_s22 = smov 8  }
   0xd   :  { %34 = dma.hbm_to_vmem [thread:$0]  %s583_s1, 512, %s29_s19, [#allocation6], %s526_s21, %s526_s21, %s527_s22  }
   0xe   :  { %s528_s25 = smov [#allocation2]   ;;  %s529_s27 = smov [#allocation7]  }
   0xf   :  { %s19_s26 = sshll.u32 %s528_s25, 4  ;;  %s42_s28 = sshll.u32 %s529_s27, 4  ;;  %s20_s26 = int_to_ptr.vmem [resolvable:$true] %s19_s26  ;;  %s43_s28 = int_to_ptr.vmem [resolvable:$true] %s42_s28 }
  0x10   :  { %s467_s29 = scalar_lea.vmem %s20_s26, 64  ;;  %p472_p6 = scmp.lt.s32.totalorder %s20_s26, %s20_s26 }
  0x11   :  { %p468_p5 = scmp.ne.s32.totalorder %s20_s26, %s467_s29  ;;  %p473_p7 = scmp.lt.s32.totalorder %s467_s29, %s467_s29 }
  0x13   :  { %p474_p8 = por %p473_p7, %p472_p6 }
  0x15   :  { %p475_p9 = pnand %p474_p8, %p468_p5 }
  0x17   :  { %478 = shalt.err (!%p475_p9)
}
  0x18   :  { %22 = dma.hbm_to_vmem [thread:$0]  %s582_s0, 64, %s20_s26, [#allocation3]  }
  0x19   :  { %s487_s7 = scalar_lea.vmem %s43_s28, 2048  ;;  %p492_p11 = scmp.lt.s32.totalorder %s43_s28, %s43_s28 }
  0x1a   :  { %p488_p10 = scmp.ne.s32.totalorder %s43_s28, %s487_s7  ;;  %p493_p12 = scmp.lt.s32.totalorder %s487_s7, %s487_s7 }
  0x1c   :  { %p494_p13 = por %p493_p12, %p492_p11 }
  0x1e   :  { %p495_p0 = pnand %p494_p13, %p488_p10 }
  0x20   :  { %498 = shalt.err (!%p495_p0)
}
  0x21   :  { %s530_s1 = smov 64   ;;  %s531_s8 = smov 4  }
  0x22   :  { %48 = dma.hbm_to_vmem [thread:$0]  %s585_s3, 2048, %s43_s28, [#allocation6], %s530_s1, %s530_s1, %s531_s8  }
  0x23   :  { %519 = dma.done.wait [#allocation3], 64  }
  0x24   :  { %520 = vsyncadd [#allocation3], 4294967232 }
  0x25   :  { %521 = dma.done.wait [#allocation6], 2560  }
  0x26   :  { %522 = vsyncadd [#allocation6], 4294964736  ;;  %v532_v0 = vmov 0   ;;  %v411_v1 = vld [vmem:[#allocation5 + $0x14] ss:$8 sps:$4 sm:$0xff]   ;;  %vm131_vm0 = vcmask 261120   ;;  %v101_v22 = vlaneseq }
  0x27   :  { %167 = vmatprep.mubr.bf16.mxu0 %v532_v0  ;;  %v413_v2 = vld [vmem:[#allocation5 + $0x10] ss:$8 sps:$4 sm:$0xff]   ;;  %147 = vmatprep.subr.bf16.mxu0 %v411_v1  ;;  %v414_v3 = vld [vmem:[#allocation5 + $0x4] ss:$8 sps:$4 sm:$0xff]   ;;  %v416_v4 = vld [vmem:[#allocation5] ss:$8 sps:$4 sm:$0xff]  }
  0x28   :  { %148 = vmatpush1.bf16.msra.mxu0 %v413_v2  ;;  %v417_v5 = vld [vmem:[#allocation7 + $0x78] sm:$0xff]   ;;  %v419_v8 = vld [vmem:[#allocation7 + $0x70] sm:$0xff]   ;;  %v421_v10 = vld [vmem:[#allocation7 + $0x68] sm:$0xff]   ;;  %v102_v23 = vshrl.u32 %v101_v22, 7  ;;  %s533_s12 = smov [#allocation8]  }
  0x29   :  { %149 = vmatprep.subr.bf16.mxu0 %v414_v3  ;;  %v418_v6 = vld [vmem:[#allocation7 + $0x38] sm:$0xff]   ;;  %380 = vmatprep.subr.bf16.mxu1 %v417_v5  ;;  %v420_v9 = vld [vmem:[#allocation7 + $0x30] sm:$0xff]   ;;  %v422_v11 = vld [vmem:[#allocation7 + $0x28] sm:$0xff]   ;;  %s345_s13 = sshll.u32 %s533_s12, 4  ;;  %s346_s13 = int_to_ptr.vmem [resolvable:$true] %s345_s13 }
  0x2a   :  { %v61_v7 = vld [vmem:[#allocation2] sm:$0xf]  ;;  %381 = vmatpush3.bf16.msra.mxu1 %v418_v6  ;;  %v423_v12 = vld [vmem:[#allocation7 + $0x60] sm:$0xff]   ;;  %v427_v16 = vld [vmem:[#allocation7 + $0x50] sm:$0xff]   ;;  %v103_v24 = vsub.s32 0, %v102_v23  ;;  %v107_v26 = vsub.s32 1, %v102_v23  ;;  %p504_p2 = scmp.lt.s32.totalorder %s346_s13, %s346_s13 }
  0x2b   :  { %382 = vmatprep.subr.bf16.mxu1 %v419_v8  ;;  %v424_v13 = vld [vmem:[#allocation7 + $0x20] sm:$0xff]   ;;  %v425_v14 = vld [vmem:[#allocation7 + $0x58] sm:$0xff]   ;;  %v428_v17 = vld [vmem:[#allocation7 + $0x10] sm:$0xff]   ;;  %s499_s14 = scalar_lea.vmem %s346_s13, 128 }
  0x2c   :  { %150 = vmatpush1.bf16.msra.mxu0 %v416_v4  ;;  %v426_v15 = vld [vmem:[#allocation7 + $0x18] sm:$0xff]   ;;  %v429_v18 = vld [vmem:[#allocation7 + $0x48] sm:$0xff]   ;;  %v431_v20 = vld [vmem:[#allocation7 + $0x40] sm:$0xff]   ;;  %p500_p1 = scmp.ne.s32.totalorder %s346_s13, %s499_s14  ;;  %p505_p3 = scmp.lt.s32.totalorder %s499_s14, %s499_s14 }
  0x2d   :  { %v430_v19 = vld [vmem:[#allocation7 + $0x8] sm:$0xff]   ;;  %v432_v21 = vld [vmem:[#allocation7] sm:$0xff]   ;;  %v66_v25 = vld [vmem:[%s584_s2] sm:$0x3] }
  0x2e   :  { %383 = vmatpush3.bf16.msra.mxu1 %v420_v9  ;;  %v104_v27 = vrot.slane %v66_v25, %v103_v24  ;;  %v108_v28 = vrot.slane %v66_v25, %v107_v26  ;;  %v362_v48 = vld [vmem:[%s586_s4] ss:$0 sm:$0xff]  ;;  %p506_p4 = por %p505_p3, %p504_p2 }
  0x2f   :  { %359 = vmatmul.mubr.msk.bf16.vlgmr.msra.gmra.mxu0 %vm131_vm0, %v61_v7  ;;  %384 = vmatprep.subr.bf16.mxu1 %v421_v10 }
  0x30   :  { %p507_p5 = pnand %p506_p4, %p500_p1 }
  0x32   :  { %385 = vmatpush3.bf16.msra.mxu1 %v422_v11 }
  0x33   :  { %386 = vmatprep.subr.bf16.mxu1 %v423_v12 }
  0x36   :  { %387 = vmatpush3.bf16.msra.mxu1 %v424_v13 }
  0x37   :  { %388 = vmatprep.subr.bf16.mxu1 %v425_v14 }
  0x3a   :  { %389 = vmatpush3.bf16.msra.mxu1 %v426_v15 }
  0x3b   :  { %390 = vmatprep.subr.bf16.mxu1 %v427_v16 }
  0x3e   :  { %391 = vmatpush3.bf16.msra.mxu1 %v428_v17 }
  0x3f   :  { %392 = vmatprep.subr.bf16.mxu1 %v429_v18 }
  0x42   :  { %393 = vmatpush3.bf16.msra.mxu1 %v430_v19 }
  0x43   :  { %394 = vmatprep.subr.bf16.mxu1 %v431_v20 }
  0x46   :  { %395 = vmatpush3.bf16.msra.mxu1 %v432_v21 }
  0xef   :  { %v169_v29 = vpop.f32.mrf.mxu0 }
  0xf0   :  { %v170_v30 = vadd.f32 %v169_v29, %v104_v27 }
  0xf1   :  { %v171_v31 = vpop.f32.mrf.mxu0 }
  0xf2   :  { %v178_v32 = vmin.f32 %v170_v30, 0.0  ;;  %v172_v33 = vadd.f32 %v171_v31, %v108_v28  ;;  %vm176_vm1 = vcmp.gt.f32.partialorder %v170_v30, 0.0 }
  0xf3   :  { %v173_v34 = vpop.f32.mrf.mxu0 }
  0xf4   :  { %v180_v35 = vmul.f32 1.442695, %v178_v32  ;;  %v179_v36 = vmin.f32 %v172_v33, 0.0  ;;  %vm177_vm2 = vcmp.gt.f32.partialorder %v172_v33, 0.0 }
  0xf5   :  { %v174_v37 = vpop.f32.mrf.mxu0 }
  0xf6   :  { %433 = vpow2.f32 %v180_v35  ;;  %v182_v38 = vmul.f32 1.442695, %v179_v36 }
  0xf8   :  { %435 = vpow2.f32 %v182_v38 }
 0x103   :  { %v434_v39 = vpop.eup %433 }
 0x104   :  { %v360_v40 = vadd.f32 -1.0, %v434_v39 }
 0x105   :  { %v436_v41 = vpop.eup %435 }
 0x106   :  { %v361_v42 = vadd.f32 -1.0, %v436_v41  ;;  %v186_v43 = vsel %vm176_vm1, %v170_v30, %v360_v40 }
 0x107   :  { %v188_v46 = vpack.c.bf16 %v186_v43, %v186_v43 }
 0x108   :  { %v187_v44 = vsel %vm177_vm2, %v172_v33, %v361_v42 }
 0x109   :  { %v189_v45 = vpack.c.bf16 %v187_v44, %v187_v44 }
 0x10b   :  { %324 = vmatprep.mubr.bf16.mxu1 %v189_v45 }
 0x10c   :  { %325 = vmatmul.mubr.bf16.vlgmr.msra.gmra.mxu1 %v188_v46 }
 0x1cc   :  { %v396_v47 = vpop.f32.mrf.mxu1 }
 0x1ce   :  { %v397_v49 = vpop.f32.mrf.mxu1 }
 0x1cf   :  { %v398_v50 = vadd.f32 %v397_v49, %v396_v47 }
 0x1d0   :  { %v399_v51 = vpop.f32.mrf.mxu1 }
 0x1d1   :  { %v327_v52 = vadd.f32 %v398_v50, %v362_v48 }
 0x1d2   :  { %v400_v53 = vpop.f32.mrf.mxu1 }
 0x1d3   :  { %v333_v54 = vmin.f32 %v327_v52, 0.0  ;;  %vm332_vm3 = vcmp.gt.f32.partialorder %v327_v52, 0.0 }
 0x1d5   :  { %v334_v55 = vmul.f32 1.442695, %v333_v54 }
 0x1d7   :  { %437 = vpow2.f32 %v334_v55 }
 0x1e4   :  { %v438_v56 = vpop.eup %437 }
 0x1e5   :  { %v379_v57 = vadd.f32 -1.0, %v438_v56 }
 0x1e7   :  { %v337_v58 = vsel %vm332_vm3, %v327_v52, %v379_v57 }
 0x1e8   :  { %338 = vst [vmem:[#allocation8] sm:$0xff] %v337_v58 }
 0x1e9   :  { %510 = shalt.err (!%p507_p5)
}
 0x1ea   :  { %348 = dma.vmem_to_hbm [thread:$0]  %s346_s13, 128, %s587_s5, [#allocation4]  }
 0x1eb   :  { %523 = dma.done.wait [#allocation4], 128  }
 0x1ec   :  { %524 = vsyncadd [#allocation4], 4294967168 }
 0x1ed   :  { %352 = vsyncpa [#allocation3], 1 }
 0x1ee   :  { %353 = vsyncpa [#allocation6], 1 }
 0x1ef   :  { %354 = vsyncpa [#allocation4], 1 }

</bundles_post_ra>
